<compile_context>
chip_gen: v5e
topology: v5e:2x2
jax: 0.10.0
libtpu: 0.0.40
codegen_flags: <defaults>
</compile_context>

<pallas_src>
import math

import jax
import jax.numpy as jnp
from jax.experimental import pallas as pl
from jax.experimental.pallas import tpu as pltpu

# Small, deterministic configuration consistent with the module's forward.
B, S, H, C = 4, 16, 32, 2          # batch, seq, hidden_size, class_label (premise -> 2)
VOCAB, N_LAYERS, FFN = 64, 4, 64   # tiny synthetic "roberta"
H4 = 4 * H                         # 128 -> exactly one vreg lane width


# ----------------------------------------------------------------------------
# Pallas kernel: masked mean pool (x4 layers, fused) + cls Linear (VPU/XLU) +
#                softmax + CE loss + argmax + accuracy.  Single slab output.
# ----------------------------------------------------------------------------
def ft_head_kernel(h_ref, mask_ref, w_ref, bias_ref, lbl_ref, out_ref):
    # h_ref    : (B, S, 4H) f32 VMEM  = [h12 | h11 | h10 | h09] along hidden axis
    # mask_ref : (B, S, 1)  f32 VMEM  (S on sublanes -> lane broadcast is free)
    # w_ref    : (C, 4H)    f32 VMEM  = cls weight in lanes [0,H), zeros elsewhere
    # bias_ref : (C,)       f32 SMEM
    # lbl_ref  : (B, 1)     i32 VMEM
    # out_ref  : (B, 2*4H)  f32 VMEM  lanes [0,128) pooled, lanes 128.. misc
    inv_s = jnp.float32(1.0 / S)
    inv_b = jnp.float32(1.0 / B)

    # torch.mean(h * mask.unsqueeze(-1), dim=1) divides by S (NOT mask sum).
    # One VPU multiply (lane-broadcast mask) + one sublane reduce gives all four
    # layer means at once.
    pooled = jnp.sum(h_ref[...] * mask_ref[...], axis=1) * inv_s     # (B, 4H)

    # logits = self.cls(h12_mean) -- VPU broadcast-multiply + lane reduce (XLU);
    # w_ref rows are zero outside lanes [0,H) so only the h12 portion contributes.
    w = w_ref[...]                                                    # (C, 4H)
    logits = jnp.sum(pooled[:, None, :] * w[None, :, :], axis=-1)     # (B, C)

    cls_iota = jax.lax.broadcasted_iota(jnp.int32, (B, C), 1)         # (B, C)
    # C == 2 (args.premise forces class_label = 2): single select for the bias.
    bias_row = jnp.where(cls_iota == 0, bias_ref[0], bias_ref[1])     # (B, C)
    logits = logits + bias_row

    lbl_col = lbl_ref[...]                                            # (B, 1) i32

    # probability = softmax(logits)  (dim=1 for a 2-D tensor in torch)
    mx = jnp.max(logits, axis=1, keepdims=True)                       # (B, 1)
    ex = jnp.exp(logits - mx)                                         # (B, C)
    denom = jnp.sum(ex, axis=1, keepdims=True)                        # (B, 1)
    prob = ex * pl.reciprocal(denom, approx=True)                     # EUP divide

    # loss = F.cross_entropy(logits, label)  (mean over batch) -- exact log path
    # TODO(synk): FocalLoss path (args.gamma_focal > 0) not implemented; CE only.
    onehot = (cls_iota == lbl_col).astype(jnp.float32)                # (B, C)
    picked = jnp.sum(logits * onehot, axis=1, keepdims=True)          # (B, 1)
    lse = mx + jnp.log(denom)                                         # (B, 1)
    loss = jnp.sum(lse - picked, axis=0, keepdims=True) * inv_b       # (1, 1)

    # pred_label_id = argmax(logits, dim=1) (first max index, like torch.argmax)
    idx_or_big = jnp.where(logits == mx, cls_iota, jnp.int32(C))
    pred = jnp.min(idx_or_big, axis=1, keepdims=True)                 # (B, 1) i32
    acc = jnp.sum((pred == lbl_col).astype(jnp.float32),
                  axis=0, keepdims=True) * inv_b                      # (1, 1)

    # Assemble the misc half-slab in registers (lane-iota selects, all operands
    # broadcast along lanes), then one lane-aligned concat and ONE full store.
    lane = jax.lax.broadcasted_iota(jnp.int32, (B, H4), 1)            # (B, 4H)
    misc = jnp.where(lane == 4, acc, jnp.zeros((B, H4), jnp.float32))
    misc = jnp.where(lane == 3, loss, misc)
    misc = jnp.where(lane == 2, pred.astype(jnp.float32), misc)
    misc = jnp.where(lane == 1, prob[:, 1:2], misc)
    misc = jnp.where(lane == 0, prob[:, 0:1], misc)

    out_ref[...] = jnp.concatenate([pooled, misc], axis=-1)           # (B, 256)


@jax.jit
def ft_model_head(h12, h11, h10, h09, attention_mask, cls_wpad, cls_b, labels):
    """cls_wpad: (C, 4H) pre-padded torch-Linear weight; cls_b: (C,); labels: (B,) int32."""
    # Lane-dense packing of the four hidden states: (B, S, 4H) = (4, 16, 128).
    # allow_input_fusion lets this concat (and the mask reshape) fuse into the
    # kernel's input DMA instead of round-tripping through HBM.
    h_all = jnp.concatenate([h12, h11, h10, h09], axis=-1)
    mask3 = attention_mask[:, :, None]                  # (B, S, 1): S on sublanes
    lbl2d = labels.reshape(B, 1).astype(jnp.int32)

    vmem = lambda: pl.BlockSpec(memory_space=pltpu.MemorySpace.VMEM)
    smem = lambda: pl.BlockSpec(memory_space=pltpu.MemorySpace.SMEM)

    slab = pl.pallas_call(
        ft_head_kernel,
        out_shape=jax.ShapeDtypeStruct((B, 2 * H4), jnp.float32),
        in_specs=[vmem(), vmem(), vmem(), smem(), vmem()],
        out_specs=vmem(),
        compiler_params=pltpu.CompilerParams(
            allow_input_fusion=[True, True, False, False, False]),
    )(h_all, mask3, cls_wpad, cls_b, lbl2d)

    h12_mean = slab[:, 0 * H:1 * H]
    h11_mean = slab[:, 1 * H:2 * H]
    h10_mean = slab[:, 2 * H:3 * H]
    h09_mean = slab[:, 3 * H:4 * H]
    probability = slab[:, H4:H4 + C]
    pred_label_id = slab[:, H4 + C].astype(jnp.int32)
    loss = slab[0, H4 + C + 1]
    accuracy = slab[0, H4 + C + 2]
    return (h12_mean, h11_mean, h10_mean, h09_mean,
            probability, loss, accuracy, pred_label_id)


# ----------------------------------------------------------------------------
# Synthetic deterministic "roberta" backbone (plain JAX glue).
# TODO(synk): pretrained HF RobertaModel/BertModel + torch.load checkpoint has no
# Pallas equivalent; replaced by a tiny deterministic transformer encoder.
# ----------------------------------------------------------------------------
def layer_norm(x, g, b, eps=1e-12):
    mu = jnp.mean(x, axis=-1, keepdims=True)
    var = jnp.mean((x - mu) ** 2, axis=-1, keepdims=True)
    return (x - mu) / jnp.sqrt(var + eps) * g + b


def init_params(key):
    keys = jax.random.split(key, 3 + N_LAYERS)
    s = 0.02
    cls_w = s * jax.random.normal(keys[2], (C, H), jnp.float32)   # torch Linear: (out, in)
    params = {
        "tok_emb": s * jax.random.normal(keys[0], (VOCAB, H), jnp.float32),
        "pos_emb": s * jax.random.normal(keys[1], (S, H), jnp.float32),
        # Lane-dense classifier weight built ONCE here (not per forward):
        # row c holds W[c, :] in lanes [0, H), zeros after.
        "cls_wpad": jnp.zeros((C, H4), jnp.float32).at[:, :H].set(cls_w),
        "cls_b": jnp.zeros((C,), jnp.float32),
        "layers": [],
    }
    for l in range(N_LAYERS):
        lk = jax.random.split(keys[3 + l], 6)
        params["layers"].append({
            "wq": s * jax.random.normal(lk[0], (H, H), jnp.float32),
            "wk": s * jax.random.normal(lk[1], (H, H), jnp.float32),
            "wv": s * jax.random.normal(lk[2], (H, H), jnp.float32),
            "wo": s * jax.random.normal(lk[3], (H, H), jnp.float32),
            "w1": s * jax.random.normal(lk[4], (H, FFN), jnp.float32),
            "w2": s * jax.random.normal(lk[5], (FFN, H), jnp.float32),
            "ln1_g": jnp.ones((H,), jnp.float32), "ln1_b": jnp.zeros((H,), jnp.float32),
            "ln2_g": jnp.ones((H,), jnp.float32), "ln2_b": jnp.zeros((H,), jnp.float32),
        })
    return params


def encoder_forward(params, input_ids, attention_mask):
    x = params["tok_emb"][input_ids] + params["pos_emb"][None, :, :]   # (B, S, H)
    hidden_states = [x]
    add_mask = (1.0 - attention_mask)[:, None, :] * jnp.float32(-1e9)  # (B, 1, S)
    for lp in params["layers"]:
        q = x @ lp["wq"]; k = x @ lp["wk"]; v = x @ lp["wv"]
        scores = jnp.einsum("bqh,bkh->bqk", q, k) / math.sqrt(H) + add_mask
        attn = jax.nn.softmax(scores, axis=-1)
        ctx = jnp.einsum("bqk,bkh->bqh", attn, v) @ lp["wo"]
        x = layer_norm(x + ctx, lp["ln1_g"], lp["ln1_b"])
        ff = jax.nn.gelu(x @ lp["w1"]) @ lp["w2"]
        x = layer_norm(x + ff, lp["ln2_g"], lp["ln2_b"])
        hidden_states.append(x)
    return hidden_states


if __name__ == "__main__":
    key = jax.random.PRNGKey(0)
    k_param, k_ids, k_lbl = jax.random.split(key, 3)

    params = init_params(k_param)

    # input_data: input_ids, attention_mask (with trailing padding), label
    input_ids = jax.random.randint(k_ids, (B, S), 0, VOCAB)
    seq_iota = jnp.arange(S)[None, :]
    lengths = jnp.array([S, S - 3, S - 6, S - 1])[:, None]
    attention_mask = (seq_iota < lengths).astype(jnp.float32)           # (B, S)
    labels = jax.random.randint(k_lbl, (B,), 0, C, dtype=jnp.int32)     # (B,)

    # backbone (glue) -> hidden_states[-1..-4]
    hs = encoder_forward(params, input_ids, attention_mask)
    h12, h11, h10, h09 = hs[-1], hs[-2], hs[-3], hs[-4]

    outs = ft_model_head(h12, h11, h10, h09, attention_mask,
                         params["cls_wpad"], params["cls_b"], labels)
    jax.block_until_ready(outs)

    (h12_mean, h11_mean, h10_mean, h09_mean,
     probability, loss, accuracy, pred_label_id) = outs
    loss = float(loss)
    accuracy = float(accuracy)
    # training-mode return: (loss, accuracy, pred_label_id); inference: probability
    print("KERNEL_OK")
</pallas_src>

<mosaic_0001>
module attributes {stable_mosaic.version = 11 : i64} {
  func.func @ft_head_kernel(%arg0: memref<4x16x128xf32, #tpu.memory_space<vmem>>, %arg1: memref<4x16x1xf32, #tpu.memory_space<vmem>>, %arg2: memref<2x128xf32, #tpu.memory_space<vmem>>, %arg3: memref<2xf32, #tpu.memory_space<smem>>, %arg4: memref<4x1xi32, #tpu.memory_space<vmem>>, %arg5: memref<4x256xf32, #tpu.memory_space<vmem>>) attributes {dimension_semantics = [], scalar_prefetch = 0 : i64, scratch_operands = 0 : i64, tpu.core_type = #tpu.core_type<tc>} {
    %c0 = arith.constant 0 : index
    %c0_0 = arith.constant 0 : index
    %c0_1 = arith.constant 0 : index
    %0 = vector.load %arg0[%c0, %c0_0, %c0_1] : memref<4x16x128xf32, #tpu.memory_space<vmem>>, vector<4x16x128xf32>
    %c0_2 = arith.constant 0 : index
    %c0_3 = arith.constant 0 : index
    %c0_4 = arith.constant 0 : index
    %1 = vector.load %arg1[%c0_2, %c0_3, %c0_4] : memref<4x16x1xf32, #tpu.memory_space<vmem>>, vector<4x16x1xf32>
    %2 = vector.broadcast %1 : vector<4x16x1xf32> to vector<4x16x128xf32>
    %3 = arith.mulf %0, %2 : vector<4x16x128xf32>
    %cst = arith.constant dense<0.000000e+00> : vector<4x128xf32>
    %4 = vector.multi_reduction <add>, %3, %cst [1] : vector<4x16x128xf32> to vector<4x128xf32>
    %cst_5 = arith.constant 6.250000e-02 : f32
    %5 = vector.broadcast %cst_5 : f32 to vector<4x128xf32>
    %6 = arith.mulf %4, %5 : vector<4x128xf32>
    %c0_6 = arith.constant 0 : index
    %c0_7 = arith.constant 0 : index
    %7 = vector.load %arg2[%c0_6, %c0_7] : memref<2x128xf32, #tpu.memory_space<vmem>>, vector<2x128xf32>
    %8 = vector.shape_cast %6 : vector<4x128xf32> to vector<4x1x128xf32>
    %9 = vector.shape_cast %7 : vector<2x128xf32> to vector<1x2x128xf32>
    %10 = vector.broadcast %8 : vector<4x1x128xf32> to vector<4x2x128xf32>
    %11 = vector.broadcast %9 : vector<1x2x128xf32> to vector<4x2x128xf32>
    %12 = arith.mulf %10, %11 : vector<4x2x128xf32>
    %cst_8 = arith.constant dense<0.000000e+00> : vector<4x2xf32>
    %13 = vector.multi_reduction <add>, %12, %cst_8 [2] : vector<4x2x128xf32> to vector<4x2xf32>
    %14 = tpu.iota {dimensions = array<i32: 1>} : vector<4x2xi32>
    %c0_i32 = arith.constant 0 : i32
    %15 = vector.broadcast %c0_i32 : i32 to vector<4x2xi32>
    %16 = arith.cmpi eq, %14, %15 : vector<4x2xi32>
    %c0_9 = arith.constant 0 : index
    %17 = memref.load %arg3[%c0_9] : memref<2xf32, #tpu.memory_space<smem>>
    %c1 = arith.constant 1 : index
    %18 = memref.load %arg3[%c1] : memref<2xf32, #tpu.memory_space<smem>>
    %19 = vector.broadcast %17 : f32 to vector<4x2xf32>
    %20 = vector.broadcast %18 : f32 to vector<4x2xf32>
    %21 = arith.select %16, %19, %20 : vector<4x2xi1>, vector<4x2xf32>
    %22 = arith.addf %13, %21 : vector<4x2xf32>
    %c0_10 = arith.constant 0 : index
    %c0_11 = arith.constant 0 : index
    %23 = vector.load %arg4[%c0_10, %c0_11] : memref<4x1xi32, #tpu.memory_space<vmem>>, vector<4x1xi32>
    %cst_12 = arith.constant dense<0xFF800000> : vector<4xf32>
    %24 = vector.multi_reduction <maximumf>, %22, %cst_12 [1] : vector<4x2xf32> to vector<4xf32>
    %25 = vector.shape_cast %24 : vector<4xf32> to vector<4x1xf32>
    %26 = vector.broadcast %25 : vector<4x1xf32> to vector<4x2xf32>
    %27 = arith.subf %22, %26 : vector<4x2xf32>
    %28 = math.exp %27 : vector<4x2xf32>
    %cst_13 = arith.constant dense<0.000000e+00> : vector<4xf32>
    %29 = vector.multi_reduction <add>, %28, %cst_13 [1] : vector<4x2xf32> to vector<4xf32>
    %30 = vector.shape_cast %29 : vector<4xf32> to vector<4x1xf32>
    %31 = tpu.reciprocal %30 {approx = true} : vector<4x1xf32> -> vector<4x1xf32>
    %32 = vector.broadcast %31 : vector<4x1xf32> to vector<4x2xf32>
    %33 = arith.mulf %28, %32 : vector<4x2xf32>
    %34 = vector.broadcast %23 : vector<4x1xi32> to vector<4x2xi32>
    %35 = arith.cmpi eq, %14, %34 : vector<4x2xi32>
    %36 = arith.extui %35 : vector<4x2xi1> to vector<4x2xi32>
    %37 = arith.sitofp %36 : vector<4x2xi32> to vector<4x2xf32>
    %38 = arith.mulf %22, %37 : vector<4x2xf32>
    %cst_14 = arith.constant dense<0.000000e+00> : vector<4xf32>
    %39 = vector.multi_reduction <add>, %38, %cst_14 [1] : vector<4x2xf32> to vector<4xf32>
    %40 = vector.shape_cast %39 : vector<4xf32> to vector<4x1xf32>
    %41 = math.log %30 : vector<4x1xf32>
    %42 = arith.addf %25, %41 : vector<4x1xf32>
    %43 = arith.subf %42, %40 : vector<4x1xf32>
    %cst_15 = arith.constant dense<0.000000e+00> : vector<1xf32>
    %44 = vector.multi_reduction <add>, %43, %cst_15 [0] : vector<4x1xf32> to vector<1xf32>
    %45 = vector.shape_cast %44 : vector<1xf32> to vector<1x1xf32>
    %cst_16 = arith.constant 2.500000e-01 : f32
    %46 = vector.broadcast %cst_16 : f32 to vector<1x1xf32>
    %47 = arith.mulf %45, %46 : vector<1x1xf32>
    %48 = vector.broadcast %25 : vector<4x1xf32> to vector<4x2xf32>
    %49 = arith.cmpf oeq, %22, %48 : vector<4x2xf32>
    %c2_i32 = arith.constant 2 : i32
    %50 = vector.broadcast %c2_i32 : i32 to vector<4x2xi32>
    %51 = arith.select %49, %14, %50 : vector<4x2xi1>, vector<4x2xi32>
    %cst_17 = arith.constant dense<2147483647> : vector<4xi32>
    %52 = vector.multi_reduction <minsi>, %51, %cst_17 [1] : vector<4x2xi32> to vector<4xi32>
    %53 = vector.shape_cast %52 : vector<4xi32> to vector<4x1xi32>
    %54 = arith.cmpi eq, %53, %23 : vector<4x1xi32>
    %55 = arith.extui %54 : vector<4x1xi1> to vector<4x1xi32>
    %56 = arith.sitofp %55 : vector<4x1xi32> to vector<4x1xf32>
    %cst_18 = arith.constant dense<0.000000e+00> : vector<1xf32>
    %57 = vector.multi_reduction <add>, %56, %cst_18 [0] : vector<4x1xf32> to vector<1xf32>
    %58 = vector.shape_cast %57 : vector<1xf32> to vector<1x1xf32>
    %cst_19 = arith.constant 2.500000e-01 : f32
    %59 = vector.broadcast %cst_19 : f32 to vector<1x1xf32>
    %60 = arith.mulf %58, %59 : vector<1x1xf32>
    %61 = tpu.iota {dimensions = array<i32: 1>} : vector<4x128xi32>
    %c4_i32 = arith.constant 4 : i32
    %62 = vector.broadcast %c4_i32 : i32 to vector<4x128xi32>
    %63 = arith.cmpi eq, %61, %62 : vector<4x128xi32>
    %cst_20 = arith.constant 0.000000e+00 : f32
    %64 = vector.broadcast %cst_20 : f32 to vector<4x128xf32>
    %65 = vector.shape_cast %60 : vector<1x1xf32> to vector<1x1xf32>
    %66 = vector.broadcast %65 : vector<1x1xf32> to vector<4x128xf32>
    %67 = arith.select %63, %66, %64 : vector<4x128xi1>, vector<4x128xf32>
    %c3_i32 = arith.constant 3 : i32
    %68 = vector.broadcast %c3_i32 : i32 to vector<4x128xi32>
    %69 = arith.cmpi eq, %61, %68 : vector<4x128xi32>
    %70 = vector.shape_cast %47 : vector<1x1xf32> to vector<1x1xf32>
    %71 = vector.broadcast %70 : vector<1x1xf32> to vector<4x128xf32>
    %72 = arith.select %69, %71, %67 : vector<4x128xi1>, vector<4x128xf32>
    %c2_i32_21 = arith.constant 2 : i32
    %73 = vector.broadcast %c2_i32_21 : i32 to vector<4x128xi32>
    %74 = arith.cmpi eq, %61, %73 : vector<4x128xi32>
    %75 = arith.sitofp %53 : vector<4x1xi32> to vector<4x1xf32>
    %76 = vector.shape_cast %75 : vector<4x1xf32> to vector<4x1xf32>
    %77 = vector.broadcast %76 : vector<4x1xf32> to vector<4x128xf32>
    %78 = arith.select %74, %77, %72 : vector<4x128xi1>, vector<4x128xf32>
    %c1_i32 = arith.constant 1 : i32
    %79 = vector.broadcast %c1_i32 : i32 to vector<4x128xi32>
    %80 = arith.cmpi eq, %61, %79 : vector<4x128xi32>
    %81 = vector.extract_strided_slice %33 {offsets = [0, 1], sizes = [4, 1], strides = [1, 1]} : vector<4x2xf32> to vector<4x1xf32>
    %82 = vector.shape_cast %81 : vector<4x1xf32> to vector<4x1xf32>
    %83 = vector.broadcast %82 : vector<4x1xf32> to vector<4x128xf32>
    %84 = arith.select %80, %83, %78 : vector<4x128xi1>, vector<4x128xf32>
    %c0_i32_22 = arith.constant 0 : i32
    %85 = vector.broadcast %c0_i32_22 : i32 to vector<4x128xi32>
    %86 = arith.cmpi eq, %61, %85 : vector<4x128xi32>
    %87 = vector.extract_strided_slice %33 {offsets = [0, 0], sizes = [4, 1], strides = [1, 1]} : vector<4x2xf32> to vector<4x1xf32>
    %88 = vector.shape_cast %87 : vector<4x1xf32> to vector<4x1xf32>
    %89 = vector.broadcast %88 : vector<4x1xf32> to vector<4x128xf32>
    %90 = arith.select %86, %89, %84 : vector<4x128xi1>, vector<4x128xf32>
    %91 = tpu.concatenate %6, %90 in 1 : vector<4x128xf32>, vector<4x128xf32> -> vector<4x256xf32>
    %c0_23 = arith.constant 0 : index
    %c0_24 = arith.constant 0 : index
    %92 = vector.load %arg5[%c0_23, %c0_24] : memref<4x256xf32, #tpu.memory_space<vmem>>, vector<4x256xf32>
    tpu.vector_store %arg5[%c0_23, %c0_24], %91 {strides = array<i32>} : memref<4x256xf32, #tpu.memory_space<vmem>>, vector<4x256xf32>,
    return
  }
}

</mosaic_0001>

<bundles_post_ra>
// kernel: ft_model_head.2
= control target key start
LH: loop header
LB: loop body
LE: loop exit
PB: predicated region body
PF: predicated region fallthrough
CT: control target
= control target key end

     0   :  { %s1765_s0 = inlined_call_operand.vmem [shape: f32[4,16,1], index: 0, kind: input, shape index: {}]   ;;  %s1766_s1 = inlined_call_operand.vmem [shape: f32[2,128], index: 1, kind: input, shape index: {}]   ;;  %s1767_s2 = inlined_call_operand.vmem [shape: f32[2], index: 2, kind: input, shape index: {}]   ;;  %s1768_s3 = inlined_call_operand.vmem [shape: s32[4,1], index: 3, kind: input, shape index: {}]   ;;  %s1769_s4 = inlined_call_operand.vmem [shape: f32[4,16,32], index: 4, kind: input, shape index: {}]   ;;  %s1770_s5 = inlined_call_operand.<no memory space> [shape: f32[], index: 5, kind: input, shape index: {}]   ;;  %s1771_s6 = inlined_call_operand.hbm [shape: f32[4,16,32], index: 6, kind: input, shape index: {}]   ;;  %s1772_s7 = inlined_call_operand.hbm [shape: f32[4,16,32], index: 7, kind: input, shape index: {}]   ;;  %s1773_s8 = inlined_call_operand.hbm [shape: f32[4,16,32], index: 8, kind: input, shape index: {}]   ;;  %s1774_s9 = inlined_call_operand.vmem [shape: f32[4,256], index: 9, kind: output, shape index: {}]  }
   0x1   :  { %v1348_v0 = vstv %s1770_s5 }
   0x2   :  { %18 = vsyncpa [#allocation23], 0 }
   0x3   :  { %19 = vsyncpa [#allocation26], 0 }
   0x4   :  { %20 = vsyncpa [#allocation24], 0  ;;  %s68_s13 = sshll.u32 %s1772_s7, 4  ;;  %s1284_s14 = smov [#allocation25]   ;;  %s69_s13 = int_to_ptr.hbm [resolvable:$true] %s68_s13 }
   0x5   :  { %s70_s15 = sshll.u32 %s1284_s14, 4  ;;  %s46_s18 = sshll.u32 %s1771_s6, 4  ;;  %s71_s15 = int_to_ptr.vmem [resolvable:$true] %s70_s15  ;;  %s47_s18 = int_to_ptr.hbm [resolvable:$true] %s46_s18 }
   0x6   :  { %s1285_s19 = smov 128   ;;  %s1286_s20 = smov 8  }
   0x7   :  { %76 = dma.hbm_to_vmem [thread:$0]  %s69_s13, 1024, %s71_s15, [#allocation26], %s1285_s19, %s1285_s19, %s1286_s20  }
   0x8   :  { %s1287_s5 = smov [#allocation22]   ;;  %s81_s24 = sshll.u32 %s1773_s8, 4  ;;  %s82_s24 = int_to_ptr.hbm [resolvable:$true] %s81_s24 }
   0x9   :  { %s48_s21 = sshll.u32 %s1287_s5, 4  ;;  %s99_s26 = sshll.u32 %s1767_s2, 4  ;;  %s49_s21 = int_to_ptr.vmem [resolvable:$true] %s48_s21  ;;  %s100_s26 = int_to_ptr.vmem [resolvable:$true] %s99_s26 }
   0xa   :  { %54 = dma.hbm_to_vmem [thread:$0]  %s47_s18, 1024, %s49_s21, [#allocation23], %s1285_s19, %s1285_s19, %s1286_s20  }
   0xb   :  { %s1288_s27 = smov [#allocation27]   ;;  %s1289_s6 = smov [#allocation28]  }
   0xc   :  { %s83_s28 = sshll.u32 %s1288_s27, 4  ;;  %s84_s28 = int_to_ptr.vmem [resolvable:$true] %s83_s28 }
   0xd   :  { %89 = dma.hbm_to_vmem [thread:$0]  %s82_s24, 1024, %s84_s28, [#allocation26], %s1285_s19, %s1285_s19, %s1286_s20  }
   0xe   :  { %102 = dma.vmem_to_smem %s100_s26, 16, %s1289_s6, [#allocation24]  }
   0xf   :  { %1278 = dma.done.wait [#allocation23], 1024  }
  0x10   :  { %1279 = vsyncadd [#allocation23], 4294966272 }
  0x11   :  { %1280 = dma.done.wait [#allocation26], 2048  }
  0x12   :  { %1281 = vsyncadd [#allocation26], 4294965248 }
  0x13   :  { %1282 = dma.done.wait [#allocation24], 16  }
  0x14   :  { %1283 = vsyncadd [#allocation24], 4294967280 }
  0x15   :  { %121 = sfence }
  0x16   :  { %v149_v1 = vlaneseq  ;;  %v223_v4 = vld [vmem:[#allocation22 + $0x8] sm:$0xff]  ;;  %v172_v5 = vld [vmem:[#allocation25] sm:$0xff]  ;;  %s1290_s10 = smov 64   ;;  %s1291_s11 = smov 32   ;;  %v305_v22 = vld [vmem:[#allocation25 + $0x10] sm:$0xff]  ;;  %v1293_v45 = vmov 0  }
  0x17   :  { %v148_v6 = vld [vmem:[%s1769_s4] sm:$0xff]  ;;  %v237_v13 = vld [vmem:[#allocation25 + $0x8] sm:$0xff]  ;;  %s1292_s12 = smov 96   ;;  %v291_v23 = vld [vmem:[#allocation22 + $0x10] sm:$0xff]  ;;  %1163 = vset.pattern.permute.xlu2 %v1293_v45  ;;  %1162 = vset.pattern.permute.xlu1 %v1293_v45  ;;  %vm782_vm4 = vcmask 1041408   ;;  %vm836_vm5 = vcmask 1041409  }
  0x18   :  { %v1363_v2 = vand.u32 127, %v149_v1  ;;  %v1140_v14 = vld [vmem:[%s1769_s4 + $0x8] sm:$0xff]  ;;  %v160_v15 = vld [vmem:[#allocation22] sm:$0xff]  ;;  %v1141_v24 = vld [vmem:[%s1769_s4 + $0x10] sm:$0xff]  ;;  %1161 = vset.pattern.permute.xlu0 %v1293_v45  ;;  %vm838_vm6 = vcmask 1042434   ;;  %vm840_vm7 = vcmask 1043459  }
  0x19   :  { %v373_v31 = vld [vmem:[#allocation25 + $0x18] sm:$0xff]  ;;  %v509_v40 = vld [vmem:[#allocation25 + $0x28] sm:$0xff]  ;;  %v441_v41 = vld [vmem:[#allocation25 + $0x20] sm:$0xff]  ;;  %s1147_s15 = sld [smem:[#allocation28 + $0x1]]  ;;  %vm843_vm9 = vcmask 11264  }
  0x1a   :  { %v1366_v3 = vadd.s32 128, %v1363_v2  ;;  %vm168_vm0 = vcmp.lt.s32.totalorder %v1363_v2, 64  ;;  %vm180_vm1 = vcmp.lt.s32.totalorder %v1363_v2, 96  ;;  %vm156_vm2 = vcmp.lt.s32.totalorder %v1363_v2, 32  ;;  %v359_v32 = vld [vmem:[#allocation22 + $0x18] sm:$0xff]  ;;  %v1143_v42 = vld [vmem:[%s1769_s4 + $0x20] sm:$0xff] }
  0x1b   :  { %v1142_v33 = vld [vmem:[%s1769_s4 + $0x18] sm:$0xff]  ;;  %v427_v50 = vld [vmem:[#allocation22 + $0x20] sm:$0xff]  ;;  %v577_v52 = vld [vmem:[#allocation25 + $0x30] sm:$0xff]  ;;  %vm797_vm8 = vcmp.eq.s32.totalorder %v1363_v2, 0 }
  0x1c   :  { %vm152_vm3 = vcmp.lt.s32.totalorder %v1366_v3, 160  ;;  %v645_v51 = vld [vmem:[#allocation25 + $0x38] sm:$0xff]  ;;  %v563_v60 = vld [vmem:[#allocation22 + $0x30] sm:$0xff]  ;;  %v495_v61 = vld [vmem:[#allocation22 + $0x28] sm:$0xff] }
  0x1d   :  { %v229_v7 = vsel %vm152_vm3, %v223_v4, %v1348_v0  ;;  %v177_v8 = vsel %vm152_vm3, %v172_v5, %v1348_v0  ;;  %v153_v9 = vsel %vm152_vm3, %v148_v6, %v1348_v0  ;;  %v243_v16 = vsel %vm152_vm3, %v237_v13, %v1348_v0  ;;  %v631_v59 = vld [vmem:[#allocation22 + $0x38] sm:$0xff]  ;;  %v691_v3 = vld [vmem:[%s1765_s0 + $0x10] sm:$0xff] }
  0x1e   :  { %v233_v10 = vsel %vm168_vm0, %v229_v7, %v1348_v0  ;;  %v181_v11 = vsel %vm180_vm1, %v177_v8, %v1348_v0  ;;  %v157_v12 = vsel %vm156_vm2, %v153_v9, %v1348_v0  ;;  %v215_v17 = vsel %vm152_vm3, %v1140_v14, %v1348_v0  ;;  %v1146_v8 = vld [vmem:[%s1769_s4 + $0x38] sm:$0xff]  ;;  %v1145_v9 = vld [vmem:[%s1769_s4 + $0x30] sm:$0xff] }
  0x1f   :  { %234 = vrot.lane.b32.xlu2 %v233_v10, %s1290_s10  ;;  %182 = vrot.lane.b32.xlu1 %v181_v11, %s1291_s11  ;;  %v165_v18 = vsel %vm152_vm3, %v160_v15, %v1348_v0  ;;  %v247_v19 = vsel %vm180_vm1, %v243_v16, %v1348_v0  ;;  %v219_v20 = vsel %vm156_vm2, %v215_v17, %v1348_v0  ;;  %v1144_v10 = vld [vmem:[%s1769_s4 + $0x28] sm:$0xff] }
  0x20   :  { %158 = vrot.lane.b32.xlu0 %v157_v12, %s1292_s12  ;;  %v169_v21 = vsel %vm168_vm0, %v165_v18, %v1348_v0  ;;  %v311_v25 = vsel %vm152_vm3, %v305_v22, %v1348_v0  ;;  %v297_v26 = vsel %vm152_vm3, %v291_v23, %v1348_v0  ;;  %v283_v27 = vsel %vm152_vm3, %v1141_v24, %v1348_v0  ;;  %v690_v17 = vld [vmem:[%s1765_s0 + $0x8] sm:$0xff]  ;;  %v689_v18 = vld [vmem:[%s1765_s0] sm:$0xff]  ;;  %v696_v22 = vld [vmem:[%s1765_s0 + $0x38] sm:$0xff] }
  0x21   :  { %v315_v28 = vsel %vm180_vm1, %v311_v25, %v1348_v0  ;;  %v301_v29 = vsel %vm168_vm0, %v297_v26, %v1348_v0  ;;  %v287_v30 = vsel %vm156_vm2, %v283_v27, %v1348_v0  ;;  %v379_v34 = vsel %vm152_vm3, %v373_v31, %v1348_v0  ;;  %v695_v23 = vld [vmem:[%s1765_s0 + $0x30] sm:$0xff] }
  0x22   :  { %v365_v35 = vsel %vm152_vm3, %v359_v32, %v1348_v0  ;;  %v351_v36 = vsel %vm152_vm3, %v1142_v33, %v1348_v0  ;;  %v383_v37 = vsel %vm180_vm1, %v379_v34, %v1348_v0  ;;  %v515_v43 = vsel %vm152_vm3, %v509_v40, %v1348_v0 }
  0x23   :  { %v369_v38 = vsel %vm168_vm0, %v365_v35, %v1348_v0  ;;  %v355_v39 = vsel %vm156_vm2, %v351_v36, %v1348_v0  ;;  %v447_v44 = vsel %vm152_vm3, %v441_v41, %v1348_v0  ;;  %v419_v46 = vsel %vm152_vm3, %v1143_v42, %v1348_v0 }
  0x24   :  { %v519_v47 = vsel %vm180_vm1, %v515_v43, %v1348_v0  ;;  %v451_v48 = vsel %vm180_vm1, %v447_v44, %v1348_v0  ;;  %v423_v49 = vsel %vm156_vm2, %v419_v46, %v1348_v0  ;;  %v433_v53 = vsel %vm152_vm3, %v427_v50, %v1348_v0 }
  0x25   :  { %v651_v54 = vsel %vm152_vm3, %v645_v51, %v1348_v0  ;;  %v583_v55 = vsel %vm152_vm3, %v577_v52, %v1348_v0  ;;  %v437_v56 = vsel %vm168_vm0, %v433_v53, %v1348_v0  ;;  %v637_v62 = vsel %vm152_vm3, %v631_v59, %v1348_v0 }
  0x26   :  { %v655_v57 = vsel %vm180_vm1, %v651_v54, %v1348_v0  ;;  %v587_v58 = vsel %vm180_vm1, %v583_v55, %v1348_v0  ;;  %v569_v63 = vsel %vm152_vm3, %v563_v60, %v1348_v0  ;;  %v501_v4 = vsel %vm152_vm3, %v495_v61, %v1348_v0  ;;  %v319_v54 = vld [vmem:[#allocation27 + $0x10] sm:$0xff]  ;;  %v387_v55 = vld [vmem:[#allocation27 + $0x18] sm:$0xff] }
  0x27   :  { %248 = vrot.lane.b32.xlu2 %v247_v19, %s1291_s11  ;;  %220 = vrot.lane.b32.xlu1 %v219_v20, %s1292_s12  ;;  %v641_v5 = vsel %vm168_vm0, %v637_v62, %v1348_v0  ;;  %v573_v6 = vsel %vm168_vm0, %v569_v63, %v1348_v0  ;;  %v505_v7 = vsel %vm168_vm0, %v501_v4, %v1348_v0  ;;  %v693_v19 = vld [vmem:[%s1765_s0 + $0x20] sm:$0xff]  ;;  %v692_v20 = vld [vmem:[%s1765_s0 + $0x18] sm:$0xff]  ;;  %v523_v4 = vld [vmem:[#allocation27 + $0x28] sm:$0xff]  ;;  %vm1043_vm0 = vcmask 3072  }
  0x28   :  { %170 = vrot.lane.b32.xlu0 %v169_v21, %s1290_s10  ;;  %v623_v11 = vsel %vm152_vm3, %v1146_v8, %v1348_v0  ;;  %v555_v12 = vsel %vm152_vm3, %v1145_v9, %v1348_v0  ;;  %v487_v13 = vsel %vm152_vm3, %v1144_v10, %v1348_v0  ;;  %v694_v21 = vld [vmem:[%s1765_s0 + $0x28] sm:$0xff]  ;;  %v324_v59 = vsel %vm156_vm2, %v319_v54, %v1348_v0 }
  0x29   :  { %v627_v14 = vsel %vm156_vm2, %v623_v11, %v1348_v0  ;;  %v559_v15 = vsel %vm156_vm2, %v555_v12, %v1348_v0  ;;  %v491_v16 = vsel %vm156_vm2, %v487_v13, %v1348_v0  ;;  %v392_v60 = vsel %vm156_vm2, %v387_v55, %v1348_v0  ;;  %v659_v12 = vld [vmem:[#allocation27 + $0x38] sm:$0xff] }
  0x2a   :  { %v528_v11 = vsel %vm156_vm2, %v523_v4, %v1348_v0  ;;  %vm1052_vm3 = vcmp.eq.s32.totalorder %v1363_v2, 4 }
  0x2f   :  { %316 = vrot.lane.b32.xlu2 %v315_v28, %s1291_s11  ;;  %302 = vrot.lane.b32.xlu1 %v301_v29, %s1290_s10 }
  0x30   :  { %288 = vrot.lane.b32.xlu0 %v287_v30, %s1292_s12 }
  0x37   :  { %384 = vrot.lane.b32.xlu2 %v383_v37, %s1291_s11  ;;  %370 = vrot.lane.b32.xlu1 %v369_v38, %s1290_s10 }
  0x38   :  { %356 = vrot.lane.b32.xlu0 %v355_v39, %s1292_s12 }
  0x3f   :  { %520 = vrot.lane.b32.xlu2 %v519_v47, %s1291_s11  ;;  %452 = vrot.lane.b32.xlu1 %v451_v48, %s1291_s11  ;;  %v184_v47 = vld [vmem:[#allocation27] sm:$0xff]  ;;  %v251_v48 = vld [vmem:[#allocation27 + $0x8] sm:$0xff] }
  0x40   :  { %424 = vrot.lane.b32.xlu0 %v423_v49, %s1292_s12  ;;  %v189_v49 = vsel %vm156_vm2, %v184_v47, %v1348_v0  ;;  %v256_v50 = vsel %vm156_vm2, %v251_v48, %v1348_v0 }
  0x47   :  { %438 = vrot.lane.b32.xlu2 %v437_v56, %s1290_s10  ;;  %656 = vrot.lane.b32.xlu1 %v655_v57, %s1291_s11  ;;  %v455_v57 = vld [vmem:[#allocation27 + $0x20] sm:$0xff] }
  0x48   :  { %588 = vrot.lane.b32.xlu0 %v587_v58, %s1291_s11  ;;  %v460_v63 = vsel %vm156_vm2, %v455_v57, %v1348_v0 }
  0x4f   :  { %642 = vrot.lane.b32.xlu2 %v641_v5, %s1290_s10  ;;  %574 = vrot.lane.b32.xlu1 %v573_v6, %s1290_s10 }
  0x50   :  { %506 = vrot.lane.b32.xlu0 %v505_v7, %s1290_s10 }
  0x57   :  { %628 = vrot.lane.b32.xlu2 %v627_v14, %s1292_s12  ;;  %560 = vrot.lane.b32.xlu1 %v559_v15, %s1292_s12 }
  0x58   :  { %492 = vrot.lane.b32.xlu0 %v491_v16, %s1292_s12 }
  0x5f   :  { %709 = vperm.xlu2 %1163, %v691_v3   ;;  %704 = vperm.xlu1 %1162, %v690_v17  }
  0x60   :  { %699 = vperm.xlu0 %1161, %v689_v18  }
  0x67   :  { %719 = vperm.xlu2 %1163, %v693_v19   ;;  %714 = vperm.xlu1 %1162, %v692_v20   ;;  %v664_v19 = vsel %vm156_vm2, %v659_v12, %v1348_v0 }
  0x68   :  { %724 = vperm.xlu0 %1161, %v694_v21  }
  0x6f   :  { %734 = vperm.xlu2 %1163, %v696_v22   ;;  %729 = vperm.xlu1 %1162, %v695_v23   ;;  %v591_v22 = vld [vmem:[#allocation27 + $0x30] sm:$0xff] }
  0x79   :  { %v235_v24 = vpop.permute.xlu2 %234 }
  0x81   :  { %v249_v25 = vpop.permute.xlu2 %248 }
  0x82   :  { %v259_v53 = vmax.f32 %v256_v50, %v249_v25  ;;  %v1621_v25 = vshrl.u32 %v149_v1, 7 }
  0x84   :  { %v263_v62 = vmax.f32 %v259_v53, %v235_v24  ;;  %1164 = vset.pattern.permute.xlu2 %v1621_v25 }
  0x89   :  { %v317_v26 = vpop.permute.xlu2 %316 }
  0x8a   :  { %v327_v5 = vmax.f32 %v324_v59, %v317_v26 }
  0x91   :  { %v183_v27 = vpop.permute.xlu1 %182  ;;  %v385_v29 = vpop.permute.xlu2 %384 }
  0x92   :  { %v159_v28 = vpop.permute.xlu0 %158  ;;  %v192_v51 = vmax.f32 %v189_v49, %v183_v27  ;;  %v395_v6 = vmax.f32 %v392_v60, %v385_v29 }
  0x99   :  { %v221_v30 = vpop.permute.xlu1 %220  ;;  %v521_v34 = vpop.permute.xlu2 %520 }
  0x9a   :  { %v171_v31 = vpop.permute.xlu0 %170  ;;  %v267_v7 = vmax.f32 %v263_v62, %v221_v30  ;;  %v531_v17 = vmax.f32 %v528_v11, %v521_v34  ;;  %v596_v30 = vsel %vm156_vm2, %v591_v22, %v1348_v0  ;;  %vm983_vm2 = vcmask 1043456  }
  0x9b   :  { %v196_v61 = vmax.f32 %v192_v51, %v171_v31 }
  0x9d   :  { %v200_v10 = vmax.f32 %v196_v61, %v159_v28 }
  0xa1   :  { %v303_v32 = vpop.permute.xlu1 %302  ;;  %v439_v37 = vpop.permute.xlu2 %438 }
  0xa2   :  { %v1591_v33 = vpop.permute.xlu0 %288  ;;  %v331_v16 = vmax.f32 %v327_v5, %v303_v32 }
  0xa4   :  { %v335_v26 = vmax.f32 %v331_v16, %v1591_v33 }
  0xa9   :  { %v371_v35 = vpop.permute.xlu1 %370  ;;  %v643_v40 = vpop.permute.xlu2 %642 }
  0xaa   :  { %v357_v36 = vpop.permute.xlu0 %356  ;;  %v399_v3 = vmax.f32 %v395_v6, %v371_v35 }
  0xac   :  { %v403_v27 = vmax.f32 %v399_v3, %v357_v36 }
  0xb1   :  { %v453_v38 = vpop.permute.xlu1 %452  ;;  %v1595_v43 = vpop.permute.xlu2 %628 }
  0xb2   :  { %v425_v39 = vpop.permute.xlu0 %424  ;;  %v463_v8 = vmax.f32 %v460_v63, %v453_v38 }
  0xb4   :  { %v467_v18 = vmax.f32 %v463_v8, %v439_v37 }
  0xb6   :  { %v471_v29 = vmax.f32 %v467_v18, %v425_v39 }
  0xb9   :  { %v657_v41 = vpop.permute.xlu1 %656  ;;  %v710_v58 = vpop.permute.xlu2 %709 }
  0xba   :  { %v1593_v42 = vpop.permute.xlu0 %588  ;;  %v667_v28 = vmax.f32 %v664_v19, %v657_v41  ;;  %v739_v35 = vmul.f32 %v710_v58, %v335_v26 }
  0xbb   :  { %v599_v33 = vmax.f32 %v596_v30, %v1593_v42  ;;  %v777_v42 = vld [vmem:[%s1766_s1] sm:$0x3]  ;;  %s798_s1 = sld [smem:[#allocation28]] }
  0xbc   :  { %v671_v48 = vmax.f32 %v667_v28, %v643_v40 }
  0xbe   :  { %v675_v54 = vmax.f32 %v671_v48, %v1595_v43 }
  0xc1   :  { %v575_v44 = vpop.permute.xlu1 %574  ;;  %v720_v20 = vpop.permute.xlu2 %719  ;;  %v800_v28 = vstv %s798_s1 }
  0xc2   :  { %v507_v46 = vpop.permute.xlu0 %506  ;;  %v603_v49 = vmax.f32 %v599_v33, %v575_v44 }
  0xc3   :  { %v535_v23 = vmax.f32 %v531_v17, %v507_v46  ;;  %v741_v46 = vmul.f32 %v720_v20, %v471_v29  ;;  %v801_v29 = vstv %s1147_s15 }
  0xc4   :  { %v802_v30 = vsel %vm797_vm8, %v800_v28, %v801_v29 }
  0xc9   :  { %v1603_v52 = vpop.permute.xlu1 %560  ;;  %v735_v0 = vpop.permute.xlu2 %734 }
  0xca   :  { %v493_v56 = vpop.permute.xlu0 %492  ;;  %v607_v55 = vmax.f32 %v603_v49, %v1603_v52  ;;  %v744_v60 = vmul.f32 %v735_v0, %v675_v54 }
  0xcb   :  { %v539_v31 = vmax.f32 %v535_v23, %v493_v56 }
  0xd1   :  { %v705_v9 = vpop.permute.xlu1 %704 }
  0xd2   :  { %v738_v13 = vmul.f32 %v705_v9, %v267_v7  ;;  %v700_v14 = vpop.permute.xlu0 %699 }
  0xd3   :  { %v737_v15 = vmul.f32 %v700_v14, %v200_v10 }
  0xd5   :  { %v745_v21 = vadd.f32 %v738_v13, %v737_v15 }
  0xd7   :  { %v746_v24 = vrot.slane %v745_v21, 4 }
  0xd9   :  { %v747_v32 = vadd.f32 %v746_v24, %v745_v21  ;;  %v715_v34 = vpop.permute.xlu1 %714 }
  0xda   :  { %v740_v37 = vmul.f32 %v715_v34, %v403_v27  ;;  %v725_v38 = vpop.permute.xlu0 %724 }
  0xdb   :  { %v748_v1 = vrot.slane %v747_v32, 2  ;;  %v742_v47 = vmul.f32 %v725_v38, %v539_v31 }
  0xdc   :  { %v752_v36 = vadd.f32 %v740_v37, %v739_v35 }
  0xdd   :  { %v749_v39 = vadd.f32 %v748_v1, %v747_v32  ;;  %v759_v41 = vadd.f32 %v742_v47, %v741_v46 }
  0xde   :  { %v753_v50 = vrot.slane %v752_v36, 4 }
  0xdf   :  { %v760_v51 = vrot.slane %v759_v41, 4  ;;  %v750_v53 = vrot.slane %v749_v39, 1 }
  0xe0   :  { %v754_v56 = vadd.f32 %v753_v50, %v752_v36 }
  0xe1   :  { %v761_v57 = vadd.f32 %v760_v51, %v759_v41  ;;  %v730_v58 = vpop.permute.xlu1 %729  ;;  %v751_v59 = vadd.f32 %v750_v53, %v749_v39 }
  0xe2   :  { %v755_v40 = vrot.slane %v754_v56, 2  ;;  %v743_v61 = vmul.f32 %v730_v58, %v607_v55 }
  0xe3   :  { %v762_v44 = vrot.slane %v761_v57, 2  ;;  %v773_v62 = vmul.f32 0.0625, %v751_v59 }
  0xe4   :  { %v756_v63 = vadd.f32 %v755_v40, %v754_v56  ;;  %v766_v4 = vadd.f32 %v744_v60, %v743_v61 }
  0xe5   :  { %v763_v5 = vadd.f32 %v762_v44, %v761_v57  ;;  %v778_v43 = vmul.f32 %v777_v42, %v773_v62 }
  0xe6   :  { %v767_v6 = vrot.slane %v766_v4, 4  ;;  %v757_v52 = vrot.slane %v756_v63, 1 }
  0xe7   :  { %v783_v7 = vsel %vm782_vm4, %v778_v43, 0.0  ;;  %v764_v8 = vrot.slane %v763_v5, 1 }
  0xe8   :  { %v768_v9 = vadd.f32 %v767_v6, %v766_v4  ;;  %784 = vadd.xlane.f32.xlu0 %v783_v7  ;;  %v758_v10 = vadd.f32 %v757_v52, %v756_v63 }
  0xe9   :  { %v765_v11 = vadd.f32 %v764_v8, %v763_v5  ;;  %v1685_v5 = vld [vmem:[%s1768_s3] sm:$0xf] }
  0xea   :  { %v769_v12 = vrot.slane %v768_v9, 2  ;;  %v774_v13 = vmul.f32 0.0625, %v758_v10 }
  0xeb   :  { %v775_v14 = vmul.f32 0.0625, %v765_v11 }
  0xec   :  { %v770_v15 = vadd.f32 %v769_v12, %v768_v9  ;;  %v779_v16 = vmul.f32 %v777_v42, %v774_v13  ;;  %v1119_v3 = vsel %vm836_vm5, %v774_v13, %v773_v62 }
  0xed   :  { %v780_v17 = vmul.f32 %v777_v42, %v775_v14  ;;  %v1120_v18 = vsel %vm838_vm6, %v775_v14, %v1119_v3 }
  0xee   :  { %v786_v19 = vsel %vm782_vm4, %v779_v16, 0.0  ;;  %v771_v20 = vrot.slane %v770_v15, 1 }
  0xef   :  { %787 = vadd.xlane.f32.xlu1 %v786_v19  ;;  %v789_v21 = vsel %vm782_vm4, %v780_v17, 0.0 }
  0xf0   :  { %790 = vadd.xlane.f32.xlu2 %v789_v21  ;;  %v772_v22 = vadd.f32 %v771_v20, %v770_v15 }
  0xf2   :  { %v776_v23 = vmul.f32 0.0625, %v772_v22  ;;  %v1294_v22 = vmov 0.0  }
  0xf4   :  { %v781_v24 = vmul.f32 %v777_v42, %v776_v23  ;;  %v1640_v26 = vsel %vm840_vm7, %v776_v23, %v1120_v18 }
  0xf6   :  { %v792_v27 = vsel %vm782_vm4, %v781_v24, 0.0  ;;  %vm1059_vm4 = vcmp.eq.s32.totalorder %v1363_v2, 3 }
  0xf7   :  { %793 = vadd.xlane.f32.xlu0 %v792_v27 }
 0x108   :  { %808 = vperm.xlu2 %1164, %v802_v30  }
 0x110   :  { %1165 = vset.pattern.permute.xlu2 %v1293_v45 }
 0x15b   :  { %v785_v32 = vpop.xlane.xlu0 %784 }
 0x162   :  { %v788_v34 = vpop.xlane.xlu1 %787 }
 0x163   :  { %v791_v31 = vpop.xlane.xlu2 %790 }
 0x16a   :  { %v794_v1 = vpop.xlane.xlu0 %793 }
 0x16b   :  { %v809_v35 = vpop.permute.xlu2 %808 }
 0x16c   :  { %v1647_v37 = vadd.f32 %v809_v35, %v785_v32  ;;  %v1649_v38 = vadd.f32 %v809_v35, %v788_v34  ;;  %v1651_v46 = vadd.f32 %v809_v35, %v791_v31  ;;  %v1656_v47 = vadd.f32 %v809_v35, %v794_v1 }
 0x16e   :  { %827 = vperm.xlu2 %1165, %v1651_v46   ;;  %824 = vperm.xlu0 %1161, %v1649_v38  }
 0x16f   :  { %821 = vperm.xlu1 %1162, %v1647_v37  }
 0x176   :  { %1166 = vset.pattern.permute.xlu2 %v1621_v25  ;;  %1175 = vset.pattern.permute.xlu0 %v1621_v25 }
 0x177   :  { %830 = vperm.xlu1 %1162, %v1656_v47  }
 0x17e   :  { %1000 = vperm.xlu2 %1166, %v1363_v2  }
 0x186   :  { %1167 = vset.pattern.permute.xlu2 %v1293_v45 }
 0x1c8   :  { %v828_v41 = vpop.permute.xlu2 %827 }
 0x1c9   :  { %v834_v50 = vperm.slane %v828_v41, %v1363_v2 }
 0x1d8   :  { %v1001_v57 = vpop.permute.xlu2 %1000 }
 0x1e0   :  { %v825_v33 = vpop.permute.xlu0 %824 }
 0x1e1   :  { %v822_v48 = vpop.permute.xlu1 %821  ;;  %v833_v39 = vperm.slane %v825_v33, %v1363_v2 }
 0x1e2   :  { %v832_v36 = vperm.slane %v822_v48, %v1363_v2 }
 0x1e4   :  { %v837_v49 = vsel %vm836_vm5, %v833_v39, %v832_v36 }
 0x1e5   :  { %v839_v53 = vsel %vm838_vm6, %v834_v50, %v837_v49 }
 0x1e9   :  { %v831_v0 = vpop.permute.xlu1 %830 }
 0x1ea   :  { %v835_v51 = vperm.slane %v831_v0, %v1363_v2 }
 0x1ec   :  { %v841_v54 = vsel %vm840_vm7, %v835_v51, %v839_v53 }
 0x1ed   :  { %v844_v55 = vsel %vm843_vm9, %v841_v54, -inf }
 0x1ee   :  { %845 = vmax.xlane.f32.xlu0 %v844_v55 }
 0x261   :  { %v1671_v56 = vpop.xlane.xlu0 %845 }
 0x262   :  { %v849_v58 = vperm.slane %v1671_v56, 1  ;;  %v848_v59 = vperm.slane %v1671_v56, 0  ;;  %v851_v61 = vperm.slane %v1671_v56, 3  ;;  %v850_v42 = vperm.slane %v1671_v56, 2 }
 0x264   :  { %vm993_vm10 = vcmp.eq.f32.partialorder %v1649_v38, %v849_v58  ;;  %vm992_vm11 = vcmp.eq.f32.partialorder %v1647_v37, %v848_v59  ;;  %vm995_vm12 = vcmp.eq.f32.partialorder %v1656_v47, %v851_v61  ;;  %vm994_vm13 = vcmp.eq.f32.partialorder %v1651_v46, %v850_v42 }
 0x265   :  { %v1003_v60 = vsel %vm993_vm10, %v1001_v57, 2  ;;  %v1002_v40 = vsel %vm992_vm11, %v1001_v57, 2  ;;  %v1005_v44 = vsel %vm995_vm12, %v1001_v57, 2  ;;  %v1004_v62 = vsel %vm994_vm13, %v1001_v57, 2 }
 0x266   :  { %1010 = vperm.xlu2 %1167, %v1003_v60   ;;  %1007 = vperm.xlu1 %1162, %v1002_v40   ;;  %v856_v63 = vsub.f32 %v1647_v37, %v848_v59  ;;  %v859_v43 = vsub.f32 %v1656_v47, %v851_v61  ;;  %v857_v21 = vsub.f32 %v1649_v38, %v849_v58  ;;  %vm1064_vm10 = vcmp.eq.s32.totalorder %v1363_v2, 1 }
 0x267   :  { %v858_v30 = vsub.f32 %v1651_v46, %v850_v42 }
 0x268   :  { %v860_v4 = vmul.f32 1.442695, %v856_v63  ;;  %v866_v6 = vmul.f32 1.442695, %v859_v43  ;;  %v862_v28 = vmul.f32 1.442695, %v857_v21 }
 0x269   :  { %v864_v31 = vmul.f32 1.442695, %v858_v30 }
 0x26a   :  { %1182 = vpow2.f32 %v860_v4 }
 0x26b   :  { %1184 = vpow2.f32 %v866_v6 }
 0x26c   :  { %1186 = vpow2.f32 %v862_v28 }
 0x26d   :  { %1188 = vpow2.f32 %v864_v31 }
 0x26e   :  { %1016 = vperm.xlu2 %1167, %v1005_v44   ;;  %1013 = vperm.xlu1 %1162, %v1004_v62  }
 0x270   :  { %v1690_v52 = vpop.eup %1182 }
 0x271   :  { %v1693_v7 = vpop.eup %1184 }
 0x272   :  { %v1187_v32 = vpop.eup %1186 }
 0x273   :  { %v1189_v34 = vpop.eup %1188 }
 0x276   :  { %910 = vperm.xlu1 %1162, %v1685_v5   ;;  %1168 = vset.pattern.permute.xlu2 %v1621_v25 }
 0x27e   :  { %873 = vperm.xlu1 %1162, %v1690_v52  }
 0x286   :  { %882 = vperm.xlu1 %1162, %v1693_v7  }
 0x2c0   :  { %v1011_v8 = vpop.permute.xlu2 %1010 }
 0x2c1   :  { %v1019_v25 = vperm.slane %v1011_v8, %v1363_v2 }
 0x2c8   :  { %v1017_v11 = vpop.permute.xlu2 %1016 }
 0x2c9   :  { %v1021_v14 = vperm.slane %v1017_v11, %v1363_v2 }
 0x2d8   :  { %v1008_v9 = vpop.permute.xlu1 %1007 }
 0x2d9   :  { %v1018_v10 = vperm.slane %v1008_v9, %v1363_v2 }
 0x2db   :  { %v1022_v15 = vsel %vm836_vm5, %v1019_v25, %v1018_v10 }
 0x2e0   :  { %v1014_v12 = vpop.permute.xlu1 %1013 }
 0x2e1   :  { %v1020_v13 = vperm.slane %v1014_v12, %v1363_v2 }
 0x2e3   :  { %v1023_v16 = vsel %vm838_vm6, %v1020_v13, %v1022_v15 }
 0x2e4   :  { %v1024_v3 = vsel %vm840_vm7, %v1021_v14, %v1023_v16 }
 0x2e5   :  { %v1704_v17 = vsel %vm843_vm9, %v1024_v3, 2147483647 }
 0x2e6   :  { %v1027_v18 = vshra.s32 %v1704_v17, 16  ;;  %v1026_v12 = vand.u32 65535, %v1704_v17 }
 0x2e8   :  { %v911_v19 = vpop.permute.xlu1 %910  ;;  %v1707_v20 = vcvt.s32.f32 %v1027_v18 }
 0x2e9   :  { %vm912_vm14 = vcmp.eq.s32.totalorder %v1363_v2, %v911_v19 }
 0x2ea   :  { %v1148_v23 = vsel %vm912_vm14, 1.0, %v1294_v22  ;;  %1030 = vmin.xlane.f32.xlu1 %v1707_v20 }
 0x2eb   :  { %v916_v24 = vperm.slane %v1148_v23, 0  ;;  %v923_v27 = vperm.slane %v1148_v23, 1  ;;  %v937_v59 = vperm.slane %v1148_v23, 3 }
 0x2ed   :  { %v1169_v29 = vpack.i.bf16 %v923_v27, %v916_v24 }
 0x2ef   :  { %1170 = vperm.xlu2 %1168, %v1169_v29  }
 0x2f0   :  { %v874_v33 = vpop.permute.xlu1 %873 }
 0x2f1   :  { %v884_v0 = vperm.slane %v874_v33, %v1363_v2 }
 0x2f7   :  { %1174 = vset.pattern.permute.xlu2 %v1293_v45 }
 0x2f8   :  { %876 = vperm.xlu2 %1174, %v1187_v32   ;;  %v883_v50 = vpop.permute.xlu1 %882 }
 0x2f9   :  { %v887_v54 = vperm.slane %v883_v50, %v1363_v2 }
 0x300   :  { %879 = vperm.xlu2 %1174, %v1189_v34  }
 0x349   :  { %v1171_v35 = vpop.permute.xlu2 %1170 }
 0x34a   :  { %v1172_v1 = vunpack.i.l.bf16 %v1171_v35  ;;  %v1173_v36 = vunpack.i.h.bf16 %v1171_v35 }
 0x34c   :  { %v948_v48 = vmul.f32 %v1172_v1, %v1647_v37  ;;  %v949_v41 = vmul.f32 %v1173_v36, %v1649_v38  ;;  %v930_v38 = vperm.slane %v1148_v23, 2 }
 0x34e   :  { %957 = vperm.xlu2 %1174, %v948_v48   ;;  %v1176_v60 = vpack.i.bf16 %v937_v59, %v930_v38 }
 0x352   :  { %v877_v39 = vpop.permute.xlu2 %876 }
 0x353   :  { %v885_v49 = vperm.slane %v877_v39, %v1363_v2 }
 0x355   :  { %v888_v55 = vsel %vm836_vm5, %v885_v49, %v884_v0 }
 0x356   :  { %960 = vperm.xlu2 %1174, %v949_v41  }
 0x35a   :  { %v880_v51 = vpop.permute.xlu2 %879 }
 0x35b   :  { %v886_v53 = vperm.slane %v880_v51, %v1363_v2 }
 0x35d   :  { %v889_v37 = vsel %vm838_vm6, %v886_v53, %v888_v55  ;;  %v1031_v25 = vpop.xlane.xlu1 %1030 }
 0x35e   :  { %v890_v57 = vsel %vm840_vm7, %v887_v54, %v889_v37  ;;  %vm1032_vm15 = vcmp.eq.f32.partialorder %v1707_v20, %v1031_v25 }
 0x35f   :  { %v892_v58 = vsel %vm843_vm9, %v890_v57, 0.0 }
 0x360   :  { %893 = vadd.xlane.f32.xlu0 %v892_v58 }
 0x374   :  { %1177 = vperm.xlu0 %1175, %v1176_v60  }
 0x37c   :  { %1181 = vset.pattern.permute.xlu0 %v1293_v45 }
 0x3a8   :  { %v958_v21 = vpop.permute.xlu2 %957 }
 0x3a9   :  { %v968_v27 = vperm.slane %v958_v21, %v1363_v2 }
 0x3b0   :  { %v961_v23 = vpop.permute.xlu2 %960 }
 0x3b1   :  { %v969_v20 = vperm.slane %v961_v23, %v1363_v2 }
 0x3d3   :  { %v1726_v40 = vpop.xlane.xlu0 %893 }
 0x3d4   :  { %1190 = vrcp.f32 %v1726_v40 }
 0x3d5   :  { %1192 = vlog2.f32 %v1726_v40 }
 0x3da   :  { %v1191_v61 = vpop.eup %1190 }
 0x3db   :  { %v898_v43 = vperm.slane %v1191_v61, 1  ;;  %v899_v9 = vperm.slane %v1191_v61, 2  ;;  %v900_v16 = vperm.slane %v1191_v61, 3  ;;  %v1193_v37 = vpop.eup %1192 }
 0x3dc   :  { %v980_v57 = vmul.f32 0.6931472, %v1193_v37 }
 0x3dd   :  { %v906_v6 = vmul.f32 %v1187_v32, %v898_v43  ;;  %v907_v45 = vmul.f32 %v1189_v34, %v899_v9  ;;  %v908_v3 = vmul.f32 %v1693_v7, %v900_v16  ;;  %v1037_v34 = vcvt.f32.s32 %v1031_v25 }
 0x3df   :  { %v1066_v8 = vperm.slane %v906_v6, 1  ;;  %v1067_v10 = vperm.slane %v907_v45, 1  ;;  %v1091_v11 = vperm.slane %v906_v6, 0  ;;  %v1068_v18 = vperm.slane %v908_v3, 1 }
 0x3e0   :  { %v1093_v19 = vperm.slane %v908_v3, 0  ;;  %v1038_v1 = vshll.u32 %v1037_v34, 16  ;;  %v1092_v55 = vperm.slane %v907_v45, 0 }
 0x3e6   :  { %v1178_v42 = vpop.permute.xlu0 %1177 }
 0x3e7   :  { %v1180_v44 = vunpack.i.h.bf16 %v1178_v42  ;;  %v1179_v62 = vunpack.i.l.bf16 %v1178_v42 }
 0x3e9   :  { %v951_v63 = vmul.f32 %v1180_v44, %v1656_v47  ;;  %v950_v4 = vmul.f32 %v1179_v62, %v1651_v46  ;;  %v1028_v47 = vcvt.s32.f32 %v1026_v12  ;;  %v897_v46 = vperm.slane %v1191_v61, 0 }
 0x3eb   :  { %966 = vperm.xlu1 %1162, %v951_v63   ;;  %963 = vperm.xlu2 %1174, %v950_v4   ;;  %v1033_v13 = vsel %vm1032_vm15, %v1028_v47, inf  ;;  %v905_v14 = vmul.f32 %v1690_v52, %v897_v46  ;;  %v972_v52 = vsel %vm836_vm5, %v969_v20, %v968_v27 }
 0x3ed   :  { %v1065_v15 = vperm.slane %v905_v14, 1  ;;  %v1090_v32 = vperm.slane %v905_v14, 0 }
 0x3f3   :  { %1077 = vperm.xlu1 %1162, %v1066_v8  }
 0x3fb   :  { %1080 = vperm.xlu1 %1162, %v1067_v10  }
 0x403   :  { %1102 = vperm.xlu1 %1162, %v1091_v11  }
 0x414   :  { %1034 = vmin.xlane.f32.xlu2 %v1033_v13 }
 0x42c   :  { %1074 = vperm.xlu2 %1174, %v1065_v15  }
 0x434   :  { %1083 = vperm.xlu2 %1174, %v1068_v18  }
 0x43c   :  { %1108 = vperm.xlu2 %1174, %v1093_v19  }
 0x445   :  { %v964_v17 = vpop.permute.xlu2 %963 }
 0x446   :  { %v970_v24 = vperm.slane %v964_v17, %v1363_v2 }
 0x448   :  { %v973_v7 = vsel %vm838_vm6, %v970_v24, %v972_v52 }
 0x45d   :  { %v967_v28 = vpop.permute.xlu1 %966 }
 0x45e   :  { %v971_v29 = vperm.slane %v967_v28, %v1363_v2 }
 0x460   :  { %v974_v30 = vsel %vm840_vm7, %v971_v29, %v973_v7 }
 0x461   :  { %v976_v31 = vsel %vm843_vm9, %v974_v30, 0.0  ;;  %vm1061_vm9 = vcmp.eq.s32.totalorder %v1363_v2, 2 }
 0x462   :  { %977 = vadd.xlane.f32.xlu0 %v976_v31 }
 0x476   :  { %1099 = vperm.xlu0 %1181, %v1090_v32  }
 0x487   :  { %v1035_v35 = vpop.xlane.xlu2 %1034 }
 0x488   :  { %v1036_v48 = vcvt.f32.s32 %v1035_v35 }
 0x48a   :  { %v1039_v33 = vadd.s32 %v1038_v1, %v1036_v48 }
 0x48c   :  { %vm1040_vm1 = vcmp.eq.s32.totalorder %v1039_v33, %v1685_v5  ;;  %v981_v5 = vadd.f32 %v980_v57, %v1671_v56  ;;  %v1062_v9 = vcvt.s32.f32 %v1039_v33 }
 0x48d   :  { %v1149_v36 = vsel %vm1040_vm1, 1.0, %v1294_v22  ;;  %v1078_v22 = vpop.permute.xlu1 %1077 }
 0x48e   :  { %v1044_v39 = vsel %vm1043_vm0, %v1149_v36, 0.0 }
 0x48f   :  { %v1045_v41 = vrot.slane %v1044_v39, 4  ;;  %v1075_v63 = vpop.permute.xlu2 %1074 }
 0x490   :  { %v1085_v25 = vsel %vm836_vm5, %v1078_v22, %v1075_v63 }
 0x491   :  { %v1046_v49 = vadd.f32 %v1045_v41, %v1044_v39 }
 0x493   :  { %v1047_v50 = vrot.slane %v1046_v49, 2 }
 0x495   :  { %v1048_v0 = vadd.f32 %v1047_v50, %v1046_v49  ;;  %v1081_v42 = vpop.permute.xlu1 %1080 }
 0x496   :  { %v1086_v47 = vsel %vm838_vm6, %v1081_v42, %v1085_v25 }
 0x497   :  { %v1049_v51 = vrot.slane %v1048_v0, 1  ;;  %v1084_v40 = vpop.permute.xlu2 %1083 }
 0x498   :  { %v1087_v14 = vsel %vm840_vm7, %v1084_v40, %v1086_v47 }
 0x499   :  { %v1050_v53 = vadd.f32 %v1049_v51, %v1048_v0 }
 0x49b   :  { %v1051_v54 = vmul.f32 0.25, %v1050_v53 }
 0x49d   :  { %1055 = vperm.xlu1 %1162, %v1051_v54   ;;  %v1103_v4 = vpop.permute.xlu1 %1102 }
 0x49f   :  { %v1109_v15 = vpop.permute.xlu2 %1108 }
 0x4a5   :  { %1105 = vperm.xlu1 %1162, %v1092_v55  }
 0x4d5   :  { %v978_v58 = vpop.xlane.xlu0 %977 }
 0x4d6   :  { %v982_v38 = vsub.f32 %v981_v5, %v978_v58 }
 0x4d8   :  { %v984_v59 = vsel %vm983_vm2, %v982_v38, 0.0 }
 0x4d9   :  { %v985_v60 = vrot.slane %v984_v59, 4 }
 0x4db   :  { %v986_v61 = vadd.f32 %v985_v60, %v984_v59 }
 0x4dd   :  { %v987_v44 = vrot.slane %v986_v61, 2 }
 0x4df   :  { %v988_v62 = vadd.f32 %v987_v44, %v986_v61 }
 0x4e1   :  { %v989_v43 = vrot.slane %v988_v62, 1 }
 0x4e3   :  { %v990_v6 = vadd.f32 %v989_v43, %v988_v62 }
 0x4e5   :  { %v991_v56 = vmul.f32 0.25, %v990_v6 }
 0x4e8   :  { %v1100_v12 = vpop.permute.xlu0 %1099 }
 0x4e9   :  { %v1110_v13 = vsel %vm836_vm5, %v1103_v4, %v1100_v12 }
 0x50f   :  { %v1056_v8 = vpop.permute.xlu1 %1055 }
 0x510   :  { %v1058_v45 = vsel %vm1052_vm3, %v1056_v8, 0.0 }
 0x511   :  { %v1060_v10 = vsel %vm1059_vm4, %v991_v56, %v1058_v45 }
 0x512   :  { %v1063_v11 = vsel %vm1061_vm9, %v1062_v9, %v1060_v10 }
 0x513   :  { %v1089_v3 = vsel %vm1064_vm10, %v1087_v14, %v1063_v11 }
 0x517   :  { %v1106_v46 = vpop.permute.xlu1 %1105 }
 0x518   :  { %v1111_v16 = vsel %vm838_vm6, %v1106_v46, %v1110_v13 }
 0x519   :  { %v1112_v18 = vsel %vm840_vm7, %v1109_v15, %v1111_v16 }
 0x51a   :  { %v1114_v19 = vsel %vm797_vm8, %v1112_v18, %v1089_v3 }
 0x51b   :  { %v1123_v21 = vrot.slane %v1114_v19, 4 }
 0x51d   :  { %v1124_v23 = vsel %vm983_vm2, %v1640_v26, %v1123_v21 }
 0x51e   :  { %1126 = vst [vmem:[%s1774_s9] sm:$0xff] %v1124_v23 }
 0x51f   :  { %1131 = vsyncpa [#allocation23], 1 }
 0x520   :  { %1132 = vsyncpa [#allocation26], 1 }
 0x521   :  { %1133 = vsyncpa [#allocation24], 1 }

</bundles_post_ra>
